<compile_context>
chip_gen: v7x
topology: tpu7x:2x2x1
jax: 0.10.0
libtpu: 0.0.40
codegen_flags: <defaults>
</compile_context>

<pallas_src>
import jax
import jax.numpy as jnp
from jax.experimental import pallas as pl
from jax.experimental.pallas import tpu as pltpu


def _silu(x):
    return x * jax.nn.sigmoid(x)


def _make_kernel(dim):
    def kernel(x_ref, wA_ref, bA_ref, w3_ref, b3_ref, code_ref):
        x = x_ref[0]                                                # (C, thw)
        # Fused cluster1-conv + cluster2-conv1: one MXU matmul, output width dim+C.
        pre = jnp.dot(wA_ref[...], x,
                      preferred_element_type=jnp.float32) + bA_ref[...]
        act = pre * jax.nn.sigmoid(pre)            # SiLU for both branches (dim+C, thw)
        h1 = act[:dim]                             # cluster1 output     (dim, thw)
        g = act[dim:]                              # cluster2 hidden     (C,   thw)
        h2 = jnp.dot(w3_ref[...], g,
                     preferred_element_type=jnp.float32) + b3_ref[...]
        code_ref[0] = (h1 + h2).astype(code_ref.dtype)
    return kernel


def _choose_hw_tile(hw, cap=2048):
    """Whole H*W per step when small; else the largest 128-multiple divisor <= cap."""
    if hw <= cap:
        return hw
    t = (cap // 128) * 128
    while t > 0:
        if hw % t == 0:
            return t
        t -= 128
    return hw  # fallback: single full-extent block


def projection_forward(feat, params):
    """feat: (N, C, H, W) float32 (NCHW, like PyTorch). Returns (feat, code)."""
    N, C, H, W = feat.shape
    dim = params["w1"].shape[1]
    HW = H * W
    thw = _choose_hw_tile(HW)
    assert HW % thw == 0, "H*W must be divisible by the chosen spatial tile"

    # NCHW-native view: contiguous reshape, no HBM transpose round-trips.
    x = feat.reshape(N, C, HW)

    # One-shot tiny layout prep: stack transposed folded weights so both
    # x-consuming matmuls are a single MXU issue.
    wA = jnp.concatenate([params["w1"].T, params["w2"].T], axis=0)   # (dim+C, C)
    bA = jnp.concatenate([params["b1"], params["b2"]])[:, None]      # (dim+C, 1)
    w3 = params["w3"].T                                              # (dim, C)
    b3 = params["b3"][:, None]                                       # (dim, 1)

    code_flat = pl.pallas_call(
        _make_kernel(dim),
        out_shape=jax.ShapeDtypeStruct((N, dim, HW), feat.dtype),
        grid_spec=pltpu.PrefetchScalarGridSpec(
            num_scalar_prefetch=0,
            grid=(N, HW // thw),
            in_specs=[
                pl.BlockSpec((1, C, thw), lambda n, j: (n, 0, j)),      # x slab
                pl.BlockSpec((dim + C, C), lambda n, j: (0, 0)),        # [W1^T; W2^T]
                pl.BlockSpec((dim + C, 1), lambda n, j: (0, 0)),        # [b1; b2]
                pl.BlockSpec((dim, C), lambda n, j: (0, 0)),            # W3^T
                pl.BlockSpec((dim, 1), lambda n, j: (0, 0)),            # b3
            ],
            out_specs=pl.BlockSpec((1, dim, thw), lambda n, j: (n, 0, j)),
        ),
        compiler_params=pltpu.CompilerParams(
            dimension_semantics=("parallel", "parallel")),
    )(x, wA, bA, w3, b3)

    code = code_flat.reshape(N, dim, H, W)       # free reshape, already NCHW
    # cfg.dropout == False -> return (feat, code); dropout is eval-mode identity.
    return feat, code


def _fold_bn(w, b, gamma, beta, mean, var, eps=1e-5):
    """Fold BatchNorm (inference) into a (Cin, Cout) matmul weight + bias."""
    scale = gamma / jnp.sqrt(var + eps)          # (Cout,)
    return w * scale[None, :], (b - mean) * scale + beta


def init_params(key, n_feats, dim):
    ks = jax.random.split(key, 18)

    def bn_params(k0, k1, k2, k3, c):
        gamma = 1.0 + 0.1 * jax.random.normal(k0, (c,), jnp.float32)
        beta = 0.1 * jax.random.normal(k1, (c,), jnp.float32)
        mean = 0.1 * jax.random.normal(k2, (c,), jnp.float32)
        var = jnp.abs(jax.random.normal(k3, (c,), jnp.float32)) + 0.5
        return gamma, beta, mean, var

    # cluster1: Conv2d(n_feats, dim, 1x1) + BN(dim)
    w1 = 0.05 * jax.random.normal(ks[0], (n_feats, dim), jnp.float32)
    cb1 = 0.05 * jax.random.normal(ks[1], (dim,), jnp.float32)
    w1f, b1f = _fold_bn(w1, cb1, *bn_params(ks[2], ks[3], ks[4], ks[5], dim))

    # cluster2 first block: Conv2d(n_feats, n_feats, 1x1) + BN(n_feats)
    w2 = 0.05 * jax.random.normal(ks[6], (n_feats, n_feats), jnp.float32)
    cb2 = 0.05 * jax.random.normal(ks[7], (n_feats,), jnp.float32)
    w2f, b2f = _fold_bn(w2, cb2, *bn_params(ks[8], ks[9], ks[10], ks[11], n_feats))

    # cluster2 second block: Conv2d(n_feats, dim, 1x1) + BN(dim)  (no SiLU)
    w3 = 0.05 * jax.random.normal(ks[12], (n_feats, dim), jnp.float32)
    cb3 = 0.05 * jax.random.normal(ks[13], (dim,), jnp.float32)
    w3f, b3f = _fold_bn(w3, cb3, *bn_params(ks[14], ks[15], ks[16], ks[17], dim))

    return {
        "w1": w1f, "b1": b1f,
        "w2": w2f, "b2": b2f,
        "w3": w3f, "b3": b3f,
    }


def _reference(feat, params):
    """Pure-JAX reference of the same folded computation (for sanity check)."""
    N, C, H, W = feat.shape
    x = jnp.transpose(feat, (0, 2, 3, 1)).reshape(N * H * W, C)
    h1 = _silu(x @ params["w1"] + params["b1"])
    g = _silu(x @ params["w2"] + params["b2"])
    h2 = g @ params["w3"] + params["b3"]
    code = (h1 + h2).reshape(N, H, W, -1).transpose(0, 3, 1, 2)
    return code


if __name__ == "__main__":
    key = jax.random.PRNGKey(0)
    k_feat, k_par = jax.random.split(key)

    batch, n_feats, dim, spatial = 2, 32, 16, 16
    feat = jax.random.normal(k_feat, (batch, n_feats, spatial, spatial),
                             jnp.float32)
    params = init_params(k_par, n_feats, dim)

    feat_out, code = projection_forward(feat, params)
    jax.block_until_ready(code)

    ref = _reference(feat, params)
    assert code.shape == (batch, dim, spatial, spatial)
    assert feat_out.shape == feat.shape
    assert jnp.allclose(code, ref, atol=1e-4, rtol=1e-4)

    print("KERNEL_OK")
</pallas_src>

<mosaic_0001>
module attributes {stable_mosaic.version = 11 : i64} {
  func.func @kernel(%arg0: i32, %arg1: i32, %arg2: memref<1x32x256xf32, #tpu.memory_space<vmem>>, %arg3: memref<48x32xf32, #tpu.memory_space<vmem>>, %arg4: memref<48x1xf32, #tpu.memory_space<vmem>>, %arg5: memref<16x32xf32, #tpu.memory_space<vmem>>, %arg6: memref<16x1xf32, #tpu.memory_space<vmem>>, %arg7: memref<1x16x256xf32, #tpu.memory_space<vmem>>) attributes {dimension_semantics = [#tpu.dimension_semantics<parallel>, #tpu.dimension_semantics<parallel>], iteration_bounds = array<i64: 2, 1>, scalar_prefetch = 0 : i64, scratch_operands = 0 : i64, tpu.core_type = #tpu.core_type<tc>, window_params = [{transform_indices = @transform_0, window_bounds = array<i64: 1, 32, 256>}, {pipeline_mode = #tpu.pipeline_mode<synchronous>, transform_indices = @transform_1, window_bounds = array<i64: 48, 32>}, {pipeline_mode = #tpu.pipeline_mode<synchronous>, transform_indices = @transform_2, window_bounds = array<i64: 48, 1>}, {pipeline_mode = #tpu.pipeline_mode<synchronous>, transform_indices = @transform_3, window_bounds = array<i64: 16, 32>}, {pipeline_mode = #tpu.pipeline_mode<synchronous>, transform_indices = @transform_4, window_bounds = array<i64: 16, 1>}, {transform_indices = @transform_5, window_bounds = array<i64: 1, 16, 256>}]} {
    %c0 = arith.constant 0 : index
    %c0_0 = arith.constant 0 : index
    %c0_1 = arith.constant 0 : index
    %0 = vector.load %arg2[%c0, %c0_0, %c0_1] : memref<1x32x256xf32, #tpu.memory_space<vmem>>, vector<1x32x256xf32>
    %1 = vector.shape_cast %0 : vector<1x32x256xf32> to vector<32x256xf32>
    %c0_2 = arith.constant 0 : index
    %c0_3 = arith.constant 0 : index
    %2 = vector.load %arg3[%c0_2, %c0_3] : memref<48x32xf32, #tpu.memory_space<vmem>>, vector<48x32xf32>
    %cst = arith.constant dense<0.000000e+00> : vector<48x256xf32>
    %3 = tpu.matmul %2, %1, %cst {dimension_numbers = #tpu.dot_dimension_numbers<[1], [0], [0], [1], [0, 0, 1, 1], [], []>} : vector<48x32xf32>, vector<32x256xf32>, vector<48x256xf32> -> vector<48x256xf32>
    %c0_4 = arith.constant 0 : index
    %c0_5 = arith.constant 0 : index
    %4 = vector.load %arg4[%c0_4, %c0_5] : memref<48x1xf32, #tpu.memory_space<vmem>>, vector<48x1xf32>
    %5 = vector.broadcast %4 : vector<48x1xf32> to vector<48x256xf32>
    %6 = arith.addf %3, %5 : vector<48x256xf32>
    %7 = arith.negf %6 : vector<48x256xf32>
    %8 = math.exp %7 : vector<48x256xf32>
    %cst_6 = arith.constant 1.000000e+00 : f32
    %9 = vector.broadcast %cst_6 : f32 to vector<48x256xf32>
    %10 = arith.addf %9, %8 : vector<48x256xf32>
    %11 = arith.divf %9, %10 : vector<48x256xf32>
    %12 = arith.mulf %6, %11 : vector<48x256xf32>
    %13 = vector.extract_strided_slice %12 {offsets = [0, 0], sizes = [16, 256], strides = [1, 1]} : vector<48x256xf32> to vector<16x256xf32>
    %14 = vector.extract_strided_slice %12 {offsets = [16, 0], sizes = [32, 256], strides = [1, 1]} : vector<48x256xf32> to vector<32x256xf32>
    %c0_7 = arith.constant 0 : index
    %c0_8 = arith.constant 0 : index
    %15 = vector.load %arg5[%c0_7, %c0_8] : memref<16x32xf32, #tpu.memory_space<vmem>>, vector<16x32xf32>
    %cst_9 = arith.constant dense<0.000000e+00> : vector<16x256xf32>
    %16 = tpu.matmul %15, %14, %cst_9 {dimension_numbers = #tpu.dot_dimension_numbers<[1], [0], [0], [1], [0, 0, 1, 1], [], []>} : vector<16x32xf32>, vector<32x256xf32>, vector<16x256xf32> -> vector<16x256xf32>
    %c0_10 = arith.constant 0 : index
    %c0_11 = arith.constant 0 : index
    %17 = vector.load %arg6[%c0_10, %c0_11] : memref<16x1xf32, #tpu.memory_space<vmem>>, vector<16x1xf32>
    %18 = vector.broadcast %17 : vector<16x1xf32> to vector<16x256xf32>
    %19 = arith.addf %16, %18 : vector<16x256xf32>
    %20 = arith.addf %13, %19 : vector<16x256xf32>
    %c0_12 = arith.constant 0 : index
    %c0_13 = arith.constant 0 : index
    %c0_14 = arith.constant 0 : index
    %21 = vector.load %arg7[%c0_12, %c0_13, %c0_14] : memref<1x16x256xf32, #tpu.memory_space<vmem>>, vector<1x16x256xf32>
    %22 = vector.shape_cast %21 : vector<1x16x256xf32> to vector<16x256xf32>
    %23 = vector.shape_cast %20 : vector<16x256xf32> to vector<1x16x256xf32>
    tpu.vector_store %arg7[%c0_12, %c0_13, %c0_14], %23 {strides = array<i32>} : memref<1x16x256xf32, #tpu.memory_space<vmem>>, vector<1x16x256xf32>,
    return
  }
  func.func @transform_0(%arg0: i32, %arg1: i32) -> (i32, i32, i32) {
    %c0_i32 = arith.constant 0 : i32
    %c0_i32_0 = arith.constant 0 : i32
    return %arg0, %c0_i32, %arg1 : i32, i32, i32
  }
  func.func @transform_1(%arg0: i32, %arg1: i32) -> (i32, i32) {
    %c0_i32 = arith.constant 0 : i32
    %c0_i32_0 = arith.constant 0 : i32
    %c0_i32_1 = arith.constant 0 : i32
    return %c0_i32, %c0_i32_0 : i32, i32
  }
  func.func @transform_2(%arg0: i32, %arg1: i32) -> (i32, i32) {
    %c0_i32 = arith.constant 0 : i32
    %c0_i32_0 = arith.constant 0 : i32
    %c0_i32_1 = arith.constant 0 : i32
    return %c0_i32, %c0_i32_0 : i32, i32
  }
  func.func @transform_3(%arg0: i32, %arg1: i32) -> (i32, i32) {
    %c0_i32 = arith.constant 0 : i32
    %c0_i32_0 = arith.constant 0 : i32
    %c0_i32_1 = arith.constant 0 : i32
    return %c0_i32, %c0_i32_0 : i32, i32
  }
  func.func @transform_4(%arg0: i32, %arg1: i32) -> (i32, i32) {
    %c0_i32 = arith.constant 0 : i32
    %c0_i32_0 = arith.constant 0 : i32
    %c0_i32_1 = arith.constant 0 : i32
    return %c0_i32, %c0_i32_0 : i32, i32
  }
  func.func @transform_5(%arg0: i32, %arg1: i32) -> (i32, i32, i32) {
    %c0_i32 = arith.constant 0 : i32
    %c0_i32_0 = arith.constant 0 : i32
    return %arg0, %c0_i32, %arg1 : i32, i32, i32
  }
}

</mosaic_0001>

<bundles_post_ra>
// kernel: tpu_custom_call.1
= control target key start
LH: loop header
LB: loop body
LE: loop exit
PB: predicated region body
PF: predicated region fallthrough
CT: control target
= control target key end

     0   :  { %10 = vsyncpa [#allocation3], 0  ;;  %s1182_s0 = inlined_call_operand.vmem [shape: f32[2,32,256], index: 0, kind: input, shape index: {}]   ;;  %s1183_s1 = inlined_call_operand.vmem [shape: f32[48,32], index: 1, kind: input, shape index: {}]   ;;  %s1184_s2 = inlined_call_operand.vmem [shape: f32[48,1], index: 2, kind: input, shape index: {}]   ;;  %s1185_s3 = inlined_call_operand.vmem [shape: f32[16,32], index: 3, kind: input, shape index: {}]   ;;  %s1186_s4 = inlined_call_operand.vmem [shape: f32[16,1], index: 4, kind: input, shape index: {}]   ;;  %s1187_s5 = inlined_call_operand.hbm [shape: f32[2,16,256], index: 5, kind: output, shape index: {}]  }
   0x1   :  { %12 = vsyncpa [#allocation3 + $0x1], 0  ;;  %s987_s18 = smov 0   ;;  %s989_s19 = smov 0  }
   0x2   :  { %s991_s20 = smov 0   ;;  %s993_s21 = smov 0  }
   0x3   :  { %s995_s22 = smov 0   ;;  %s997_s23 = smov 0  }
   0x4 LB: > { %s708_s24 = sadd.s32 4294967295, %s950_s23   ;;  %s709_s25 = sadd.s32 4294967294, %s950_s23   ;;  %s950_s23 = sphi %s997_s23, %s18_s23   ;;  %s946_s22 = sphi %s995_s22, %s1194_s22   ;;  %s942_s21 = sphi %s993_s21, %s1193_s21   ;;  %s938_s20 = sphi %s991_s20, %s1192_s20   ;;  %s934_s19 = sphi %s989_s19, %s1191_s19   ;;  %s930_s18 = sphi %s987_s18, %s1190_s18  }
   0x5   : > { %s30_s26 = sadd.s32 1, %s946_s22  ;;  %s151_s27 = sadd.s32 1, %s938_s20 }
   0x6   : > { %p32_p0 = scmp.ge.s32.totalorder %s30_s26, 2  ;;  %p161_p1 = scmp.ne.s32.totalorder %s938_s20, %s934_s19 }
   0x7   : > { %p162_p2 = scmp.eq.s32.totalorder %s708_s24, 1  ;;  %p167_p3 = scmp.ne.s32.totalorder %s934_s19, %s930_s18 }
   0x8   : > { %s1196_s26 = smov (%p32_p0, %s30_s26), 0  ;;  %p168_p5 = scmp.eq.s32.totalorder %s709_s25, 1 }
   0x9   : > { %p1027_p4 = por %p162_p2, %p161_p1  ;;  %s146_s29 = ssub.s32 %s946_s22, %s1196_s26 }
   0xa   : > { %p712_p6 = scmp.ge.s32.totalorder %s950_s23, 1  ;;  %p149_p7 = scmp.eq.s32.totalorder %s146_s29, 0 }
   0xb   : > { %p1034_p8 = por %p168_p5, %p167_p3  ;;  %p211_p9 = scmp.lt.s32.totalorder %s950_s23, 3 }
   0xc   : > { %s1040_s6 = scalar_select %p149_p7, %s938_s20, %s151_s27  }
   0xd   : > { %p212_p10 = pnand %p712_p6, %p211_p9 }
   0xe   : > { %p244_p11 = scmp.lt.s32.totalorder (!%p212_p10), %s942_s21, 1  ;;  %v952_v0 = vmov (!%p212_p10), 0.0   ;;  %v953_v1 = vmov (!%p212_p10), 0   ;;  %v270_v2 = vld [vmem:[%s1184_s2 + $0x10] sm:$0xff] (!%p212_p10)  ;;  %v272_v3 = vld [vmem:[%s1184_s2 + $0x20] sm:$0xff] (!%p212_p10)  ;;  %v271_v4 = vld [vmem:[%s1184_s2 + $0x18] sm:$0xff] (!%p212_p10) }
   0xf   : > { %215 = sbr.rel (%p212_p10) target bundleno = 547 (0x223), region = 40  ;;  %387 = vmatprep.mubr.f32.mxu0 (!%p212_p10), %v952_v0  ;;  %411 = vmatprep.mubr.f32.mxu1 (!%p212_p10), %v952_v0  ;;  %v273_v5 = vld [vmem:[%s1184_s2 + $0x28] sm:$0xff] (!%p212_p10)  ;;  %v268_v17 = vld [vmem:[%s1184_s2] sm:$0xff] (!%p212_p10)  ;;  %vm304_vm0 = vcmask (!%p212_p10), 261120   ;;  %v264_v26 = vld [vmem:[%s1183_s1 + $0x10] sm:$0xff] (!%p212_p10)  ;;  %s240_s14 = sand.u32 (!%p212_p10), 1, %s934_s19  }
  0x10   : > { %822 = vset.pattern.permute.xlu0 (!%p212_p10), %v953_v1  ;;  %823 = vset.pattern.permute.xlu1 (!%p212_p10), %v953_v1  ;;  %v269_v18 = vld [vmem:[%s1184_s2 + $0x8] sm:$0xff] (!%p212_p10)  ;;  %v510_v20 = vld [vmem:[%s1186_s4] sm:$0xff] (!%p212_p10)  ;;  %v265_v27 = vld [vmem:[%s1183_s1 + $0x18] sm:$0xff] (!%p212_p10)  ;;  %s713_s15 = sshll.u32 (!%p212_p10), %s240_s14, 5  ;;  %s742_s24 = sshll.u32 (!%p212_p10), %s942_s21, 9 }
  0x11   : > { %286 = vperm.xlu0 (!%p212_p10), %822, %v270_v2   ;;  %296 = vperm.xlu1 (!%p212_p10), %823, %v272_v3   ;;  %v511_v21 = vld [vmem:[%s1186_s4 + $0x8] sm:$0xff] (!%p212_p10)  ;;  %v262_v22 = vld [vmem:[%s1183_s1] sm:$0xff] (!%p212_p10)  ;;  %s242_s16 = scalar_lea.vmem (!%p212_p10), [#allocation2], %s713_s15  ;;  %s1132_s29 = scalar_lea.hbm (!%p212_p10), %s1187_s5, %s742_s24 }
  0x12   : > { %v266_v23 = vld [vmem:[%s1183_s1 + $0x20] sm:$0xff] (!%p212_p10)  ;;  %v263_v24 = vld [vmem:[%s1183_s1 + $0x8] sm:$0xff] (!%p212_p10)  ;;  %s629_s17 = sshll.u32 (!%p212_p10), %s242_s16, 4  ;;  %s954_s8 = smov (!%p212_p10), [#allocation2]   ;;  %s1127_s17 = int_to_ptr.vmem [resolvable:$true] %s629_s17 }
  0x13   : > { %v267_v25 = vld [vmem:[%s1183_s1 + $0x28] sm:$0xff] (!%p212_p10)  ;;  %s876_s9 = sshll.u32 (!%p212_p10), %s954_s8, 4  ;;  %s877_s9 = int_to_ptr.vmem [resolvable:$false] %s876_s9 }
  0x14   : > { %s878_s10 = scalar_lea.vmem (!%p212_p10), %s877_s9, 1024  ;;  %p879_p1 = scmp.lt.s32.totalorder (!%p212_p10), %s1127_s17, %s877_s9 }
  0x15   : > { %291 = vperm.xlu0 (!%p212_p10), %822, %v271_v4   ;;  %301 = vperm.xlu1 (!%p212_p10), %823, %v273_v5  }
  0x16   : > { %s245_s7 = scalar_select %p244_p11, %s942_s21, 1 }
  0x17   : > { %s1136_s21 = scalar_lea.sflag [#allocation3], %s240_s14 }
  0x18   : > { %s741_s12 = sshll.u32 %s245_s7, 6  ;;  %s872_s7 = scalar_lea.vmem %s1127_s17, 512 }
  0x19   : > { %s251_s25 = scalar_lea.vmem %s1182_s0, %s741_s12  ;;  %276 = vperm.xlu0 %822, %v268_v17   ;;  %281 = vperm.xlu1 %823, %v269_v18   ;;  %p873_p12 = scmp.ne.s32.totalorder %s1127_s17, %s872_s7 }
  0x1a   : > { %v255_v6 = vld [vmem:[%s251_s25 + $0x8] sm:$0xff]  ;;  %v257_v7 = vld [vmem:[%s251_s25 + $0x18] sm:$0xff]  ;;  %v254_v8 = vld [vmem:[%s251_s25] sm:$0xff]  ;;  %p880_p2 = scmp.lt.s32.totalorder %s878_s10, %s872_s7 }
  0x1b   : > { %v743_v9 = vpack.c.bf16 %v257_v7, %v255_v6  ;;  %v256_v10 = vld [vmem:[%s251_s25 + $0x10] sm:$0xff]  ;;  %v259_v11 = vld [vmem:[%s251_s25 + $0x28] sm:$0xff]  ;;  %v261_v12 = vld [vmem:[%s251_s25 + $0x38] sm:$0xff]  ;;  %p874_p13 = pnand %p873_p12, %p1027_p4 }
  0x1c   : > { %v745_v13 = vpack.c.bf16 %v256_v10, %v254_v8  ;;  %v747_v14 = vpack.c.bf16 %v261_v12, %v259_v11  ;;  %v258_v15 = vld [vmem:[%s251_s25 + $0x20] sm:$0xff]  ;;  %v260_v16 = vld [vmem:[%s251_s25 + $0x30] sm:$0xff]  ;;  %p881_p3 = por %p880_p2, %p879_p1 }
  0x1d   : > { %744 = vmatprep.subr.bf16.mxu0 %v743_v9  ;;  %759 = vmatprep.subr.bf16.mxu1 %v743_v9  ;;  %v749_v19 = vpack.c.bf16 %v260_v16, %v258_v15  ;;  %p875_p0 = pneg %p874_p13 }
  0x1e   : > { %746 = vmatpush1.bf16.msra.mxu0 %v745_v13  ;;  %761 = vmatpush1.bf16.msra.mxu1 %v745_v13 }
  0x1f   : > { %748 = vmatprep.subr.bf16.mxu0 %v747_v14  ;;  %760 = vmatprep.subr.bf16.mxu1 %v747_v14  ;;  %p882_p5 = pnand %p881_p3, %p875_p0 }
  0x20   : > { %514 = vperm.xlu0 %822, %v510_v20   ;;  %519 = vperm.xlu1 %823, %v511_v21  }
  0x22   : > { %750 = vmatpush1.bf16.msra.mxu0 %v749_v19  ;;  %762 = vmatpush1.bf16.msra.mxu1 %v749_v19 }
  0x25   : > { %716 = vmatmul.mubr.msk.f32.vlgmr.msra.gmra.mrb[0].mxu0 %vm304_vm0, %v262_v22  ;;  %720 = vmatmul.mubr.msk.f32.vlgmr.msra.gmra.mrb[0].mxu1 %vm304_vm0, %v266_v23 }
  0x26   : > { %393 = vmatprep.mubr.f32.mxu0 %v952_v0  ;;  %417 = vmatprep.mubr.f32.mxu1 %v952_v0 }
  0x29   : > { %717 = vmatmul.mubr.msk.f32.gmra.mrb[2].mxu0 %vm304_vm0, %v263_v24  ;;  %721 = vmatmul.mubr.msk.f32.gmra.mrb[2].mxu1 %vm304_vm0, %v267_v25 }
  0x2a   : > { %399 = vmatprep.mubr.f32.mxu0 %v952_v0  ;;  %592 = vmatprep.mubr.f32.mxu1 %v952_v0 }
  0x2d   : > { %718 = vmatmul.mubr.msk.f32.gmra.mrb[4].mxu0 %vm304_vm0, %v264_v26 }
  0x2e   : > { %405 = vmatprep.mubr.f32.mxu0 %v952_v0 }
  0x31   : > { %719 = vmatmul.mubr.msk.f32.gmra.mrb[6].mxu0 %vm304_vm0, %v265_v27 }
  0x90   : > { %v297_v28 = vpop.permute.xlu1 %296  ;;  %v287_v43 = vpop.permute.xlu0 %286 }
  0x94   : > { %v302_v35 = vpop.permute.xlu1 %301  ;;  %v292_v51 = vpop.permute.xlu0 %291 }
  0xf8   : > { %v1102_v29 = vpop.f32.mrb[0].mxu0  ;;  %v413_v30 = vpop.f32.mrb[0].mxu1 }
  0xf9   : > { %v414_v31 = vadd.f32 %v413_v30, %v297_v28  ;;  %v1104_v32 = vpop.f32.mrb[1].mxu0  ;;  %v415_v33 = vpop.f32.mrb[1].mxu1 }
  0xfa   : > { %v416_v34 = vadd.f32 %v415_v33, %v297_v28 }
  0xfb   : > { %v730_v36 = vmul.f32 -1.442695, %v414_v31 }
  0xfc   : > { %v731_v37 = vmul.f32 -1.442695, %v416_v34  ;;  %v1106_v38 = vpop.f32.mrb[2].mxu0  ;;  %v419_v39 = vpop.f32.mrb[2].mxu1 }
  0xfd   : > { %v420_v40 = vadd.f32 %v419_v39, %v302_v35  ;;  %v1108_v41 = vpop.f32.mrb[3].mxu0  ;;  %v421_v42 = vpop.f32.mrb[3].mxu1  ;;  %824 = vpow2.f32 %v730_v36  ;;  %v509_v36 = vld [vmem:[%s1185_s3 + $0x8] sm:$0xff] }
  0xfe   : > { %v422_v44 = vadd.f32 %v421_v42, %v302_v35  ;;  %826 = vpow2.f32 %v731_v37  ;;  %v277_v37 = vpop.permute.xlu0 %276  ;;  %v282_v42 = vpop.permute.xlu1 %281 }
  0xff   : > { %v732_v45 = vmul.f32 -1.442695, %v420_v40  ;;  %v390_v39 = vadd.f32 %v1102_v29, %v277_v37 }
 0x100   : > { %v733_v46 = vmul.f32 -1.442695, %v422_v44  ;;  %v401_v47 = vpop.f32.mrb[4].mxu0 }
 0x101   : > { %v402_v48 = vadd.f32 %v401_v47, %v287_v43  ;;  %v403_v49 = vpop.f32.mrb[5].mxu0  ;;  %828 = vpow2.f32 %v732_v45 }
 0x102   : > { %830 = vpow2.f32 %v733_v46  ;;  %v404_v52 = vadd.f32 %v403_v49, %v287_v43  ;;  %v722_v43 = vmul.f32 -1.442695, %v390_v39  ;;  %v398_v46 = vadd.f32 %v1108_v41, %v282_v42 }
 0x103   : > { %v726_v50 = vmul.f32 -1.442695, %v402_v48 }
 0x104   : > { %v407_v53 = vpop.f32.mrb[6].mxu0  ;;  %v727_v58 = vmul.f32 -1.442695, %v404_v52  ;;  %v725_v47 = vmul.f32 -1.442695, %v398_v46 }
 0x105   : > { %832 = vpow2.f32 %v726_v50  ;;  %v408_v54 = vadd.f32 %v407_v53, %v292_v51  ;;  %v409_v55 = vpop.f32.mrb[7].mxu0 }
 0x106   : > { %v410_v63 = vadd.f32 %v409_v55, %v292_v51 }
 0x107   : > { %v728_v56 = vmul.f32 -1.442695, %v408_v54  ;;  %v825_v57 = vpop.eup %824 }
 0x108   : > { %v468_v59 = vadd.f32 1.0, %v825_v57  ;;  %v827_v60 = vpop.eup %826  ;;  %v729_v6 = vmul.f32 -1.442695, %v410_v63 }
 0x109   : > { %834 = vpow2.f32 %v728_v56  ;;  %v469_v61 = vadd.f32 1.0, %v827_v60 }
 0x10a   : > { %836 = vpow2.f32 %v727_v58 }
 0x10b   : > { %v829_v62 = vpop.eup %828  ;;  %838 = vrcp.f32 %v468_v59 }
 0x10c   : > { %v470_v1 = vadd.f32 1.0, %v829_v62  ;;  %v831_v2 = vpop.eup %830  ;;  %840 = vrcp.f32 %v469_v61 }
 0x10d   : > { %v471_v4 = vadd.f32 1.0, %v831_v2 }
 0x10e   : > { %842 = vrcp.f32 %v470_v1  ;;  %v520_v1 = vpop.permute.xlu1 %519 }
 0x10f   : > { %v833_v3 = vpop.eup %832  ;;  %844 = vrcp.f32 %v471_v4 }
 0x110   : > { %v464_v5 = vadd.f32 1.0, %v833_v3 }
 0x112   : > { %846 = vrcp.f32 %v464_v5 }
 0x113   : > { %v835_v7 = vpop.eup %834  ;;  %848 = vpow2.f32 %v729_v6 }
 0x114   : > { %v466_v8 = vadd.f32 1.0, %v835_v7  ;;  %v837_v9 = vpop.eup %836 }
 0x115   : > { %v839_v10 = vpop.eup %838  ;;  %v465_v16 = vadd.f32 1.0, %v837_v9 }
 0x116   : > { %850 = vrcp.f32 %v466_v8  ;;  %v841_v11 = vpop.eup %840  ;;  %v504_v13 = vmul.f32 %v839_v10, %v414_v31 }
 0x117   : > { %v505_v17 = vmul.f32 %v841_v11, %v416_v34  ;;  %852 = vrcp.f32 %v465_v16  ;;  %v508_v34 = vld [vmem:[%s1185_s3] sm:$0xff] }
 0x118   : > { %v843_v12 = vpop.eup %842 }
 0x119   : > { %v506_v14 = vmul.f32 %v843_v12, %v420_v40  ;;  %v845_v15 = vpop.eup %844  ;;  %v392_v40 = vadd.f32 %v1104_v32, %v277_v37 }
 0x11a   : > { %v507_v19 = vmul.f32 %v845_v15, %v422_v44  ;;  %v396_v44 = vadd.f32 %v1106_v38, %v282_v42 }
 0x11b   : > { %v757_v18 = vpack.c.bf16 %v506_v14, %v504_v13  ;;  %v723_v45 = vmul.f32 -1.442695, %v392_v40 }
 0x11c   : > { %v847_v20 = vpop.eup %846  ;;  %v755_v22 = vpack.c.bf16 %v507_v19, %v505_v17 }
 0x11d   : > { %v849_v21 = vpop.eup %848  ;;  %v500_v25 = vmul.f32 %v847_v20, %v402_v48 }
 0x11e   : > { %v467_v23 = vadd.f32 1.0, %v849_v21 }
 0x120   : > { %v851_v24 = vpop.eup %850  ;;  %854 = vrcp.f32 %v467_v23 }
 0x121   : > { %v502_v26 = vmul.f32 %v851_v24, %v408_v54  ;;  %v853_v28 = vpop.eup %852  ;;  %856 = vpow2.f32 %v722_v43  ;;  %v515_v54 = vpop.permute.xlu0 %514 }
 0x122   : > { %v501_v33 = vmul.f32 %v853_v28, %v404_v52  ;;  %858 = vpow2.f32 %v723_v45 }
 0x123   : > { %v753_v27 = vpack.c.bf16 %v502_v26, %v500_v25 }
 0x12a   : > { %v855_v30 = vpop.eup %854 }
 0x12b   : > { %v503_v31 = vmul.f32 %v855_v30, %v410_v63  ;;  %v857_v48 = vpop.eup %856 }
 0x12c   : > { %v859_v49 = vpop.eup %858  ;;  %v460_v29 = vadd.f32 1.0, %v857_v48 }
 0x12d   : > { %v751_v35 = vpack.c.bf16 %v503_v31, %v501_v33  ;;  %v461_v32 = vadd.f32 1.0, %v859_v49 }
 0x12f   : > { %752 = vmatprep.subr.bf16.mxu1 %v751_v35 }
 0x130   : > { %754 = vmatpush1.bf16.msra.mxu1 %v753_v27 }
 0x131   : > { %756 = vmatprep.subr.bf16.mxu1 %v755_v22 }
 0x134   : > { %758 = vmatpush1.bf16.msra.mxu1 %v757_v18 }
 0x137   : > { %734 = vmatmul.mubr.msk.f32.vlgmr.msra.gmra.mrb[4].mxu1 %vm304_vm0, %v508_v34 }
 0x138   : > { %598 = vmatprep.mubr.f32.mxu1 %v952_v0  ;;  %v724_v0 = vmul.f32 -1.442695, %v396_v44 }
 0x13a   : > { %860 = vpow2.f32 %v724_v0 }
 0x13b   : > { %735 = vmatmul.mubr.msk.f32.gmra.mrb[6].mxu1 %vm304_vm0, %v509_v36  ;;  %862 = vpow2.f32 %v725_v47 }
 0x13c   : > { %864 = vrcp.f32 %v460_v29 }
 0x13d   : > { %866 = vrcp.f32 %v461_v32 }
 0x144   : > { %v861_v50 = vpop.eup %860 }
 0x145   : > { %v863_v51 = vpop.eup %862  ;;  %v462_v52 = vadd.f32 1.0, %v861_v50 }
 0x146   : > { %v463_v38 = vadd.f32 1.0, %v863_v51  ;;  %v865_v41 = vpop.eup %864 }
 0x147   : > { %868 = vrcp.f32 %v462_v52  ;;  %v867_v53 = vpop.eup %866  ;;  %v496_v56 = vmul.f32 %v865_v41, %v390_v39 }
 0x148   : > { %870 = vrcp.f32 %v463_v38  ;;  %v497_v60 = vmul.f32 %v867_v53, %v392_v40 }
 0x151   : > { %v869_v59 = vpop.eup %868 }
 0x152   : > { %v871_v62 = vpop.eup %870  ;;  %v498_v4 = vmul.f32 %v869_v59, %v396_v44 }
 0x153   : > { %v499_v7 = vmul.f32 %v871_v62, %v398_v46 }
 0x20a   : > { %v594_v55 = vpop.f32.mrb[4].mxu1 }
 0x20b   : > { %v595_v57 = vadd.f32 %v594_v55, %v515_v54  ;;  %v596_v58 = vpop.f32.mrb[5].mxu1 }
 0x20c   : > { %v597_v61 = vadd.f32 %v596_v58, %v515_v54 }
 0x20d   : > { %v605_v63 = vadd.f32 %v595_v57, %v496_v56 }
 0x20e   : > { %v606_v2 = vadd.f32 %v597_v61, %v497_v60  ;;  %v600_v3 = vpop.f32.mrb[6].mxu1 }
 0x20f   : > { %609 = vst [vmem:[%s242_s16] sm:$0xff] %v605_v63  ;;  %v601_v5 = vadd.f32 %v600_v3, %v520_v1  ;;  %v602_v6 = vpop.f32.mrb[7].mxu1 }
 0x210   : > { %610 = vst [vmem:[%s242_s16 + $0x8] sm:$0xff] %v606_v2  ;;  %v603_v8 = vadd.f32 %v602_v6, %v520_v1 }
 0x211   : > { %v607_v9 = vadd.f32 %v601_v5, %v498_v4 }
 0x212   : > { %v608_v10 = vadd.f32 %v603_v8, %v499_v7 }
 0x213   : > { %611 = vst [vmem:[%s242_s16 + $0x10] sm:$0xff] %v607_v9 }
 0x214   : > { %612 = vst [vmem:[%s242_s16 + $0x18] sm:$0xff] %v608_v10 }
 0x215   : > { %885 = shalt.err (!%p882_p5)
}
 0x216   : > { %s886_s11 = scalar_lea.hbm %s1132_s29, 512  ;;  %s890_s14 = scalar_lea.hbm %s1187_s5, 1024 }
 0x217   : > { %p887_p6 = scmp.ne.s32.totalorder %s1132_s29, %s886_s11  ;;  %p891_p10 = scmp.lt.u32.totalorder %s1132_s29, %s1187_s5 }
 0x218   : > { %p892_p11 = scmp.lt.u32.totalorder %s890_s14, %s886_s11  ;;  %p894_p13 = scmp.lt.u32.totalorder %s886_s11, %s1132_s29 }
 0x219   : > { %p888_p7 = pnand %p887_p6, %p1027_p4 }
 0x21a   : > { %p893_p12 = por %p892_p11, %p891_p10 }
 0x21b   : > { %p889_p9 = pneg %p888_p7 }
 0x21c   : > { %p895_p0 = por %p894_p13, %p893_p12 }
 0x21e   : > { %p896_p1 = pnand %p895_p0, %p889_p9 }
 0x220   : > { %899 = shalt.err (!%p896_p1)
}
 0x221   : > { %s955_s24 = smov 256   ;;  %s956_s25 = smov 16  }
 0x222   : > { %763 = dma.vmem_to_hbm [thread:$0]  (%p1027_p4), %s1127_s17, 512, %s1132_s29, %s1136_s21, %s955_s24, %s955_s24, %s956_s25  }
 0x223 PF: > { %p769_p2 = scmp.ge.s32.totalorder %s950_s23, 2  ;;  %s644_s27 = sand.u32 1, %s930_s18  }
 0x224   : > { %s645_s7 = scalar_lea.sflag [#allocation3], %s644_s27 }
 0x225   : > { %p766_p3 = pnand %p769_p2, %p1034_p8 }
 0x227   : > { %925 = dma.done.wait (!%p766_p3), %s645_s7, 512  }
 0x228   : > { %927 = vsyncadd (!%p766_p3), %s645_s7, 4294966784  ;;  %s18_s23 = sadd.s32 1, %s950_s23   ;;  %s1190_s18 = smov %s934_s19 }
 0x229   : > { %p15_p5 = scmp.ge.s32.totalorder %s18_s23, 4   ;;  %s1191_s19 = smov %s938_s20 }
 0x22a   : > { %s1192_s20 = smov %s1040_s6  ;;  %s1193_s21 = smov %s946_s22 }
 0x22b   : > { %s1194_s22 = smov %s1196_s26  ;;  %17 = sbr.rel (!%p15_p5) target bundleno = 4 (0x4), region = 75 }
 0x232   :  { %650 = vsyncpa [#allocation3], 1 }
 0x233   :  { %652 = vsyncpa [#allocation3 + $0x1], 1 }

</bundles_post_ra>
